<compile_context>
chip_gen: v7x
topology: tpu7x:2x2x1
jax: 0.10.0
libtpu: 0.0.40
codegen_flags: <defaults>
</compile_context>

<pallas_src>
import functools

import jax
import jax.numpy as jnp
from jax.experimental import pallas as pl
from jax.experimental.pallas import tpu as pltpu

_LANE = 128      # TPU lane width; weight is padded to n_pad = multiple of 128
_TILE_B = 2048   # batch tile for the gridded (large-B) path


def _single_tile_max_b():
    # v7x has 2 TensorCores per chip with per-TC HBM bandwidth: route medium
    # batches through the gridded ("parallel",) path so both TCs are used.
    # On v5e/v6e (1 TC) a bigger no-grid fast path is cheaper.
    try:
        kind = jax.devices()[0].device_kind.lower()
        if "v7" in kind:
            return 1024
    except Exception:  # pragma: no cover - device query is best-effort only
        pass
    return 4096


_SINGLE_TILE_MAX_B = _single_tile_max_b()
_SINGLE_TILE_VMEM_BUDGET = 24 << 20  # conservative vs 16/32 MiB scoped defaults


def _linear_kernel(x_ref, w_ref, b_ref, o_ref):
    """o = (x @ W_padded)[:, :n_way] + bias[:n_way]   (one MXU pass, f32 acc)."""
    n_way = o_ref.shape[-1]
    acc = jnp.dot(x_ref[...], w_ref[...], preferred_element_type=jnp.float32)
    o_ref[...] = (acc[:, :n_way] + b_ref[:, :n_way]).astype(o_ref.dtype)


def prepare_params(weight, bias, lane=_LANE):
    """One-time parameter prep (NOT on the per-forward critical path).

    weight: (n_way, dim) PyTorch nn.Linear layout; bias: (n_way,)
    Returns:
      w_prepped: (dim, n_pad) — transposed and zero-padded along lanes
      b_prepped: (1,  n_pad) — zero-padded, 2-D for TPU lane layout
    """
    n_way, dim = weight.shape
    n_pad = ((n_way + lane - 1) // lane) * lane
    w_prepped = jnp.zeros((dim, n_pad), weight.dtype).at[:, :n_way].set(weight.T)
    b_prepped = jnp.zeros((1, n_pad), bias.dtype).at[0, :n_way].set(bias)
    return w_prepped, b_prepped


@functools.partial(jax.jit, static_argnames=("n_way", "force_grid", "tile_b"))
def classifier_forward(x, w_prepped, b_prepped, n_way, force_grid=False,
                       tile_b=None):
    """x: (B, dim) f32; w_prepped: (dim, n_pad); b_prepped: (1, n_pad).

    Returns (B, n_way) logits, identical to nn.Linear(dim, n_way)(x).
    """
    B, D = x.shape
    n_pad = w_prepped.shape[1]
    itemsize = jnp.dtype(x.dtype).itemsize
    out_shape = jax.ShapeDtypeStruct((B, n_way), x.dtype)

    cost = pl.CostEstimate(
        flops=2 * B * D * n_pad,
        transcendentals=0,
        bytes_accessed=(B * D + D * n_pad + n_pad + B * n_way) * itemsize,
    )

    # Approximate single-tile VMEM footprint: x + W + bias + f32 out/acc.
    single_tile_bytes = (B * D + D * n_pad + n_pad + B * n_pad) * 4
    use_single_tile = (
        not force_grid
        and B <= _SINGLE_TILE_MAX_B
        and single_tile_bytes <= _SINGLE_TILE_VMEM_BUDGET
    )

    if use_single_tile:
        # Single-tile problem: skip the grid/pipelining machinery entirely.
        vmem_limit = int(min(max(2 * single_tile_bytes + (2 << 20), 16 << 20),
                             64 << 20))
        return pl.pallas_call(
            _linear_kernel,
            out_shape=out_shape,
            in_specs=[
                pl.BlockSpec(memory_space=pltpu.MemorySpace.VMEM),
                pl.BlockSpec(memory_space=pltpu.MemorySpace.VMEM),
                pl.BlockSpec(memory_space=pltpu.MemorySpace.VMEM),
            ],
            out_specs=pl.BlockSpec(memory_space=pltpu.MemorySpace.VMEM),
            cost_estimate=cost,
            compiler_params=pltpu.CompilerParams(vmem_limit_bytes=vmem_limit),
        )(x, w_prepped, b_prepped)

    # Large-batch path: tile only B; keep K (= dim) and the padded N resident
    # so every grid step is a single MXU pass.  Weight/bias are reused as
    # full-array blocks; batch axis is "parallel" so it can shard across
    # v7x's two TensorCores.
    tb = _TILE_B if tile_b is None else tile_b
    return pl.pallas_call(
        _linear_kernel,
        out_shape=out_shape,
        grid=(pl.cdiv(B, tb),),
        in_specs=[
            pl.BlockSpec((tb, D), lambda i: (i, 0)),
            pl.BlockSpec((D, n_pad), lambda i: (0, 0)),
            pl.BlockSpec((1, n_pad), lambda i: (0, 0)),
        ],
        out_specs=pl.BlockSpec((tb, n_way), lambda i: (i, 0)),
        cost_estimate=cost,
        compiler_params=pltpu.CompilerParams(
            dimension_semantics=("parallel",)),
    )(x, w_prepped, b_prepped)


if __name__ == "__main__":
    # Small shapes consistent with the module: Classifier(dim=32, n_way=5)
    batch, dim, n_way = 8, 32, 5

    key = jax.random.PRNGKey(0)
    kx, kw, kb, kx2 = jax.random.split(key, 4)

    x = jax.random.normal(kx, (batch, dim), dtype=jnp.float32)
    # Deterministic synthetic parameters (same shapes as nn.Linear(dim, n_way)):
    #   weight: (n_way, dim), bias: (n_way,)
    bound = 1.0 / (dim ** 0.5)
    weight = jax.random.uniform(kw, (n_way, dim), minval=-bound, maxval=bound,
                                dtype=jnp.float32)
    bias = jax.random.uniform(kb, (n_way,), minval=-bound, maxval=bound,
                              dtype=jnp.float32)

    # One-time layout prep (transpose + lane padding), then the jitted forward.
    w_p, b_p = prepare_params(weight, bias)

    # --- single-tile fast path (nominal tiny shapes) ---
    out = jax.block_until_ready(classifier_forward(x, w_p, b_p, n_way))
    ref = x @ weight.T + bias
    assert out.shape == (batch, n_way)
    assert jnp.allclose(out, ref, atol=1e-5, rtol=1e-5)

    # --- gridded (B-tiled) path, including a ragged tail block ---
    big_b = 1030  # 1030 = 2*512 + 6 -> 3 grid steps, last one partial
    x_big = jax.random.normal(kx2, (big_b, dim), dtype=jnp.float32)
    out_big = jax.block_until_ready(
        classifier_forward(x_big, w_p, b_p, n_way, force_grid=True, tile_b=512))
    ref_big = x_big @ weight.T + bias
    assert out_big.shape == (big_b, n_way)
    assert jnp.allclose(out_big, ref_big, atol=1e-4, rtol=1e-5)

    print("KERNEL_OK")
</pallas_src>

<mosaic_0001>
module attributes {stable_mosaic.version = 11 : i64} {
  func.func @_linear_kernel(%arg0: memref<8x32xf32, #tpu.memory_space<vmem>>, %arg1: memref<32x128xf32, #tpu.memory_space<vmem>>, %arg2: memref<1x128xf32, #tpu.memory_space<vmem>>, %arg3: memref<8x5xf32, #tpu.memory_space<vmem>>) attributes {dimension_semantics = [], scalar_prefetch = 0 : i64, scratch_operands = 0 : i64, tpu.core_type = #tpu.core_type<tc>} {
    %c0 = arith.constant 0 : index
    %c0_0 = arith.constant 0 : index
    %0 = vector.load %arg0[%c0, %c0_0] : memref<8x32xf32, #tpu.memory_space<vmem>>, vector<8x32xf32>
    %c0_1 = arith.constant 0 : index
    %c0_2 = arith.constant 0 : index
    %1 = vector.load %arg1[%c0_1, %c0_2] : memref<32x128xf32, #tpu.memory_space<vmem>>, vector<32x128xf32>
    %cst = arith.constant dense<0.000000e+00> : vector<8x128xf32>
    %2 = tpu.matmul %0, %1, %cst {dimension_numbers = #tpu.dot_dimension_numbers<[1], [0], [0], [1], [0, 0, 1, 1], [], []>} : vector<8x32xf32>, vector<32x128xf32>, vector<8x128xf32> -> vector<8x128xf32>
    %3 = vector.extract_strided_slice %2 {offsets = [0, 0], sizes = [8, 5], strides = [1, 1]} : vector<8x128xf32> to vector<8x5xf32>
    %c0_3 = arith.constant 0 : index
    %c0_4 = arith.constant 0 : index
    %4 = vector.load %arg2[%c0_3, %c0_4] : memref<1x128xf32, #tpu.memory_space<vmem>>, vector<1x5xf32>
    %5 = vector.broadcast %4 : vector<1x5xf32> to vector<8x5xf32>
    %6 = arith.addf %3, %5 : vector<8x5xf32>
    %c0_5 = arith.constant 0 : index
    %c0_6 = arith.constant 0 : index
    %7 = vector.load %arg3[%c0_5, %c0_6] : memref<8x5xf32, #tpu.memory_space<vmem>>, vector<8x5xf32>
    tpu.vector_store %arg3[%c0_5, %c0_6], %6 {strides = array<i32>} : memref<8x5xf32, #tpu.memory_space<vmem>>, vector<8x5xf32>,
    return
  }
}

</mosaic_0001>

<bundles_post_ra>
// kernel: classifier_forward.1
= control target key start
LH: loop header
LB: loop body
LE: loop exit
PB: predicated region body
PF: predicated region fallthrough
CT: control target
= control target key end

     0   :  { %8 = vsyncpa [#allocation3], 0  ;;  %s324_s0 = inlined_call_operand.hbm [shape: f32[8,32], index: 0, kind: input, shape index: {}]   ;;  %s325_s1 = inlined_call_operand.hbm [shape: f32[32,128], index: 1, kind: input, shape index: {}]   ;;  %s326_s2 = inlined_call_operand.vmem [shape: f32[1,128], index: 2, kind: input, shape index: {}]   ;;  %s327_s3 = inlined_call_operand.hbm [shape: f32[8,5], index: 3, kind: output, shape index: {}]  }
   0x1   :  { %9 = vsyncpa [#allocation6], 0 }
   0x2   :  { %10 = vsyncpa [#allocation4], 0  ;;  %s250_s12 = smov [#allocation2]   ;;  %s251_s14 = smov [#allocation5]  }
   0x3   :  { %s17_s13 = sshll.u32 %s250_s12, 4  ;;  %s26_s15 = sshll.u32 %s251_s14, 4  ;;  %s18_s13 = int_to_ptr.vmem [resolvable:$true] %s17_s13  ;;  %s278_s15 = int_to_ptr.vmem [resolvable:$true] %s26_s15 }
   0x4   :  { %s178_s18 = scalar_lea.hbm %s324_s0, 128 }
   0x5   :  { %p179_p0 = scmp.ne.s32.totalorder %s324_s0, %s178_s18  ;;  %p182_p1 = scmp.lt.u32.totalorder %s178_s18, %s324_s0 }
   0x7   :  { %p184_p2 = pnand %p182_p1, %p179_p0 }
   0x9   :  { %187 = shalt.err (!%p184_p2)
}
   0xa   :  { %s188_s23 = scalar_lea.vmem %s18_s13, 128  ;;  %p193_p4 = scmp.lt.s32.totalorder %s18_s13, %s18_s13 }
   0xb   :  { %p189_p3 = scmp.ne.s32.totalorder %s18_s13, %s188_s23  ;;  %p194_p5 = scmp.lt.s32.totalorder %s188_s23, %s188_s23 }
   0xd   :  { %p195_p6 = por %p194_p5, %p193_p4 }
   0xf   :  { %p196_p7 = pnand %p195_p6, %p189_p3 }
  0x11   :  { %199 = shalt.err (!%p196_p7)
}
  0x12   :  { %20 = dma.hbm_to_vmem [thread:$0]  %s324_s0, 128, %s18_s13, [#allocation3]  }
  0x13   :  { %s200_s28 = scalar_lea.hbm %s325_s1, 512 }
  0x14   :  { %p201_p8 = scmp.ne.s32.totalorder %s325_s1, %s200_s28  ;;  %p204_p9 = scmp.lt.u32.totalorder %s200_s28, %s325_s1 }
  0x16   :  { %p206_p10 = pnand %p204_p9, %p201_p8 }
  0x18   :  { %209 = shalt.err (!%p206_p10)
}
  0x19   :  { %s210_s6 = scalar_lea.vmem %s278_s15, 512  ;;  %p215_p12 = scmp.lt.s32.totalorder %s278_s15, %s278_s15 }
  0x1a   :  { %p211_p11 = scmp.ne.s32.totalorder %s278_s15, %s210_s6  ;;  %p216_p13 = scmp.lt.s32.totalorder %s210_s6, %s210_s6 }
  0x1c   :  { %p217_p0 = por %p216_p13, %p215_p12 }
  0x1e   :  { %p218_p1 = pnand %p217_p0, %p211_p11 }
  0x20   :  { %221 = shalt.err (!%p218_p1)
}
  0x21   :  { %s252_s0 = smov 128   ;;  %s253_s7 = smov 8  }
  0x22   :  { %32 = dma.hbm_to_vmem [thread:$0]  %s325_s1, 512, %s278_s15, [#allocation6], %s252_s0, %s252_s0, %s253_s7  }
  0x23   :  { %244 = dma.done.wait [#allocation3], 128  }
  0x24   :  { %245 = vsyncadd [#allocation3], 4294967168 }
  0x25   :  { %246 = dma.done.wait [#allocation6], 512  }
  0x26   :  { %247 = vsyncadd [#allocation6], 4294966784  ;;  %v254_v0 = vmov 0.0|0.0   ;;  %vm255_vm0 = vmmov 0   ;;  %v256_v1 = vmov 0.0   ;;  %v42_v2 = vld [vmem:[#allocation5] sm:$0xff] }
  0x27   :  { %164 = vmatprep.subr.bf16.mxu0 %v254_v0  ;;  %161 = vmatprep.mubr.msk.f32.mxu0 %vm255_vm0, %v256_v1  ;;  %v43_v3 = vld [vmem:[#allocation5 + $0x8] sm:$0xff]  ;;  %v44_v4 = vld [vmem:[#allocation5 + $0x10] sm:$0xff]  ;;  %v45_v6 = vld [vmem:[#allocation5 + $0x18] sm:$0xff]  ;;  %vm46_vm1 = vcmask 261120   ;;  %s257_s11 = smov [#allocation7]   ;;  %vm128_vm2 = vcmask 39936  }
  0x28   :  { %v165_v5 = vpack.c.bf16 %v43_v3, %v42_v2  ;;  %v168_v7 = vpack.c.bf16 %v45_v6, %v44_v4  ;;  %v41_v8 = vld [vmem:[#allocation2] sm:$0xff]  ;;  %s136_s12 = sshll.u32 %s257_s11, 4  ;;  %s137_s12 = int_to_ptr.vmem [resolvable:$true] %s136_s12 }
  0x29   :  { %v147_v9 = vld [vmem:[%s326_s2] ss:$0 sm:$0xff]  ;;  %s222_s13 = scalar_lea.vmem %s137_s12, 128  ;;  %p227_p3 = scmp.lt.s32.totalorder %s137_s12, %s137_s12 }
  0x2a   :  { %166 = vmatpush3.bf16.msra.mxu0 %v165_v5  ;;  %p223_p2 = scmp.ne.s32.totalorder %s137_s12, %s222_s13  ;;  %p228_p4 = scmp.lt.s32.totalorder %s222_s13, %s222_s13 }
  0x2b   :  { %167 = vmatprep.subr.bf16.mxu0 %v254_v0 }
  0x2c   :  { %p229_p5 = por %p228_p4, %p227_p3 }
  0x2e   :  { %169 = vmatpush3.bf16.msra.mxu0 %v168_v7  ;;  %p230_p6 = pnand %p229_p5, %p223_p2 }
  0x31   :  { %162 = vmatmul.mubr.msk.f32.vlgmr.msra.gmra.mrb[0].mxu0 %vm46_vm1, %v41_v8 }
 0x104   :  { %v116_v10 = vpop.f32.mrb[0].mxu0 }
 0x105   :  { %v127_v11 = vadd.f32 %v147_v9, %v116_v10  ;;  %v163_v12 = vpop.f32.mrb[1].mxu0 }
 0x107   :  { %129 = vst.msk [vmem:[#allocation7] sm:$0xff] %vm128_vm2, %v127_v11 }
 0x108   :  { %233 = shalt.err (!%p230_p6)
}
 0x109   :  { %s234_s16 = scalar_lea.hbm %s327_s3, 128 }
 0x10a   :  { %p235_p7 = scmp.ne.s32.totalorder %s327_s3, %s234_s16  ;;  %p238_p8 = scmp.lt.u32.totalorder %s234_s16, %s327_s3 }
 0x10c   :  { %p240_p9 = pnand %p238_p8, %p235_p7 }
 0x10e   :  { %243 = shalt.err (!%p240_p9)
}
 0x10f   :  { %139 = dma.vmem_to_hbm [thread:$0]  %s137_s12, 128, %s327_s3, [#allocation4]  }
 0x110   :  { %248 = dma.done.wait [#allocation4], 128  }
 0x111   :  { %249 = vsyncadd [#allocation4], 4294967168 }
 0x112   :  { %143 = vsyncpa [#allocation3], 1 }
 0x113   :  { %144 = vsyncpa [#allocation6], 1 }
 0x114   :  { %145 = vsyncpa [#allocation4], 1 }

</bundles_post_ra>
